<compile_context>
chip_gen: v7x
topology: tpu7x:2x2x1
jax: 0.10.0
libtpu: 0.0.40
codegen_flags: <defaults>
</compile_context>

<pallas_src>
import jax
import jax.numpy as jnp
from jax.experimental import pallas as pl
from jax.experimental.pallas import tpu as pltpu

LANE = 128


def _round_up(x, m):
    return ((x + m - 1) // m) * m


def qnet_mlp_kernel(obs_ref, w_ref, w1o_ref, w1w_ref, b1_ref,
                    w2_ref, b2_ref, w3_ref, b3_ref, o_ref):
    """Fused concat + 3-layer MLP for one batch tile.

    concat(obs, w) @ W1 is rewritten as obs @ W1_obs + w @ W1_w, so the
    concatenated input is never materialized.  Layer 1 runs with f32 MXU
    inputs (input precision preserved); layers 2/3 use the prepared weight
    dtype (bf16 by default) with f32 accumulation.  No reshapes/transposes.
    """
    cdt = w2_ref.dtype  # MXU input dtype for the hidden layers

    h1 = (jnp.dot(obs_ref[...], w1o_ref[...], preferred_element_type=jnp.float32)
          + jnp.dot(w_ref[...], w1w_ref[...], preferred_element_type=jnp.float32)
          + b1_ref[...])
    h1 = jnp.maximum(h1, 0.0)

    h2 = jnp.dot(h1.astype(cdt), w2_ref[...],
                 preferred_element_type=jnp.float32) + b2_ref[...]
    h2 = jnp.maximum(h2, 0.0)

    out = jnp.dot(h2.astype(cdt), w3_ref[...],
                  preferred_element_type=jnp.float32) + b3_ref[...]
    o_ref[...] = out.astype(o_ref.dtype)


def prepare_params(params, obs_dim, compute_dtype=jnp.bfloat16):
    """Split W1 (fused concat) and zero-pad hidden dims to 128 lanes.

    Call this ONCE per parameter update and cache the result; the forward
    then reduces to a single pallas_call plus a cheap reshape.

    Zero-padding of hidden dims is exact: padded hidden units compute
    ReLU(0 + 0) = 0 and contribute nothing downstream.  The output dim of
    W3/b3 is intentionally left unpadded.
    Biases may be 1-D (PyTorch style) or (1, H); both are handled.
    """
    w1, b1, w2, b2, w3, b3 = params
    b1 = jnp.asarray(b1).reshape(1, -1)
    b2 = jnp.asarray(b2).reshape(1, -1)
    b3 = jnp.asarray(b3).reshape(1, -1)

    in_dim, H1 = w1.shape
    H2, d_out = w2.shape[1], w3.shape[1]
    rew_dim = in_dim - obs_dim
    H1p, H2p = _round_up(H1, LANE), _round_up(H2, LANE)

    def pad2(a, rows, cols):
        return jnp.pad(a, ((0, rows - a.shape[0]), (0, cols - a.shape[1])))

    # Layer 1 stays f32 (keeps obs / preference-weight precision).
    w1_obs = pad2(w1[:obs_dim], obs_dim, H1p).astype(jnp.float32)
    w1_w = pad2(w1[obs_dim:obs_dim + rew_dim], rew_dim, H1p).astype(jnp.float32)
    b1p = pad2(b1, 1, H1p).astype(jnp.float32)
    # Hidden layers use the compute dtype on the MXU (f32 accumulation).
    w2p = pad2(w2, H1p, H2p).astype(compute_dtype)
    b2p = pad2(b2, 1, H2p).astype(jnp.float32)
    w3p = pad2(w3, H2p, d_out).astype(compute_dtype)   # output dim NOT padded
    b3p = b3.astype(jnp.float32)
    return (w1_obs, w1_w, b1p, w2p, b2p, w3p, b3p)


def qnet_forward(obs, w, prepared, action_dim, rew_dim, *, block_b=4096):
    """QNet.forward: q = mlp(concat(obs, w)).view(-1, action_dim, rew_dim).

    `prepared` is the output of prepare_params (hoisted out of the hot path).
    """
    B, obs_dim = obs.shape
    rew = w.shape[1]
    d_out = action_dim * rew_dim

    w1o, w1w, b1, w2, b2, w3, b3 = prepared
    assert w3.shape[1] == d_out, "prepared W3 output dim mismatch"
    H1p, H2p = w1o.shape[1], w2.shape[1]

    # Batch tiling: large, sublane-aligned tile.  Keep >= 2 grid steps when B
    # allows so v7x megacore sharding engages (harmless on v5e/v6e).
    tb = min(block_b, _round_up(B, 8))
    if B > 8 and pl.cdiv(B, tb) < 2:
        tb = max(8, _round_up(pl.cdiv(B, 2), 8))
    grid = (pl.cdiv(B, tb),)
    # VMEM (tb=4096): ~1.4 MiB double-buffered I/O tiles + ~4 MiB activations
    # + <0.2 MiB resident weights — well under the scoped default everywhere.
    # If xprof still shows exposed DMA, add pipeline_mode=pl.Buffered(3) to
    # the row_specs below.

    row_spec = lambda shape: pl.BlockSpec(shape, lambda i: (i, 0))   # batch-tiled
    fix_spec = lambda shape: pl.BlockSpec(shape, lambda i: (0, 0))   # VMEM-resident

    # Memory-heavy cost estimate (what the hardware actually moves/executes).
    flops = 2 * B * (obs_dim * H1p + rew * H1p + H1p * H2p + H2p * d_out)
    bytes_accessed = sum(int(a.size) * a.dtype.itemsize
                         for a in (obs, w, w1o, w1w, b1, w2, b2, w3, b3))
    bytes_accessed += B * d_out * 4  # f32 output, unpadded

    q_flat = pl.pallas_call(
        qnet_mlp_kernel,
        out_shape=jax.ShapeDtypeStruct((B, d_out), jnp.float32),
        grid=grid,
        in_specs=[
            row_spec((tb, obs_dim)),
            row_spec((tb, rew)),
            fix_spec(w1o.shape), fix_spec(w1w.shape), fix_spec(b1.shape),
            fix_spec(w2.shape), fix_spec(b2.shape),
            fix_spec(w3.shape), fix_spec(b3.shape),
        ],
        out_specs=row_spec((tb, d_out)),
        compiler_params=pltpu.CompilerParams(
            dimension_semantics=("parallel",)),
        cost_estimate=pl.CostEstimate(flops=flops, transcendentals=0,
                                      bytes_accessed=bytes_accessed),
    )(obs, w, w1o, w1w, b1, w2, b2, w3, b3)

    # Final view(-1, action_dim, rew_dim) — no padding to strip.
    return q_flat.reshape(-1, action_dim, rew_dim)


def init_params(key, input_dim, net_arch, output_dim):
    """Deterministic parameter init (stand-in for layer_init / orthogonal)."""
    dims = [input_dim] + list(net_arch) + [output_dim]
    params = []
    for i in range(len(dims) - 1):
        key, k_w = jax.random.split(key)
        fan_in = dims[i]
        W = jax.random.normal(k_w, (dims[i], dims[i + 1]), jnp.float32) * (1.0 / jnp.sqrt(fan_in))
        b = jnp.zeros((dims[i + 1],), jnp.float32)   # 1-D, PyTorch-style
        params.extend([W, b])
    return tuple(params)


def qnet_reference(obs, w, params, hidden_dtype=jnp.float32):
    """Pure-JAX reference mirroring the kernel's precision policy:
    layer 1 in f32; layers 2/3 matmul inputs in `hidden_dtype`; f32 accum."""
    x = jnp.concatenate([obs, w], axis=-1)
    w1, b1, w2, b2, w3, b3 = params
    b1, b2, b3 = (jnp.asarray(b).reshape(1, -1) for b in (b1, b2, b3))
    h1 = jnp.maximum(jnp.dot(x, w1, preferred_element_type=jnp.float32) + b1, 0.0)
    h2 = jnp.dot(h1.astype(hidden_dtype), w2.astype(hidden_dtype),
                 preferred_element_type=jnp.float32) + b2
    h2 = jnp.maximum(h2, 0.0)
    return jnp.dot(h2.astype(hidden_dtype), w3.astype(hidden_dtype),
                   preferred_element_type=jnp.float32) + b3


if __name__ == "__main__":
    # Small shapes consistent with the module's vector-obs path.
    batch = 8
    obs_dim = 16       # obs_shape = (16,)
    rew_dim = 4        # number of objectives
    action_dim = 6
    net_arch = [32, 32]

    key = jax.random.PRNGKey(0)
    k_obs, k_w, k_params = jax.random.split(key, 3)

    obs = jax.random.normal(k_obs, (batch, obs_dim), jnp.float32)
    # Preference weight vectors on the simplex.
    w_raw = jax.random.uniform(k_w, (batch, rew_dim), jnp.float32)
    w = w_raw / jnp.sum(w_raw, axis=-1, keepdims=True)

    input_dim = obs_dim + rew_dim
    output_dim = action_dim * rew_dim
    params = init_params(k_params, input_dim, net_arch, output_dim)

    # --- f32 path: tight correctness check vs pure-JAX reference. ---
    prepared_f32 = prepare_params(params, obs_dim, compute_dtype=jnp.float32)
    q32 = qnet_forward(obs, w, prepared_f32, action_dim, rew_dim)
    q32 = jax.block_until_ready(q32)
    assert q32.shape == (batch, action_dim, rew_dim), q32.shape
    ref32 = qnet_reference(obs, w, params).reshape(-1, action_dim, rew_dim)
    assert jnp.allclose(q32, ref32, atol=1e-4, rtol=1e-4), "f32 mismatch vs reference"

    # --- bf16 hidden-layer path (optimized config; layer-1 inputs stay f32). ---
    prepared_bf16 = prepare_params(params, obs_dim, compute_dtype=jnp.bfloat16)
    qbf = qnet_forward(obs, w, prepared_bf16, action_dim, rew_dim)
    qbf = jax.block_until_ready(qbf)
    assert qbf.shape == (batch, action_dim, rew_dim), qbf.shape
    refbf = qnet_reference(obs, w, params,
                           hidden_dtype=jnp.bfloat16).reshape(-1, action_dim, rew_dim)
    assert jnp.allclose(qbf, refbf, atol=2e-2, rtol=2e-2), "bf16 mismatch vs reference"

    print("KERNEL_OK")
</pallas_src>

<mosaic_0001>
module attributes {stable_mosaic.version = 11 : i64} {
  func.func @qnet_mlp_kernel(%arg0: i32, %arg1: memref<8x16xf32, #tpu.memory_space<vmem>>, %arg2: memref<8x4xf32, #tpu.memory_space<vmem>>, %arg3: memref<16x128xf32, #tpu.memory_space<vmem>>, %arg4: memref<4x128xf32, #tpu.memory_space<vmem>>, %arg5: memref<1x128xf32, #tpu.memory_space<vmem>>, %arg6: memref<128x128xf32, #tpu.memory_space<vmem>>, %arg7: memref<1x128xf32, #tpu.memory_space<vmem>>, %arg8: memref<128x24xf32, #tpu.memory_space<vmem>>, %arg9: memref<1x24xf32, #tpu.memory_space<vmem>>, %arg10: memref<8x24xf32, #tpu.memory_space<vmem>>) attributes {dimension_semantics = [#tpu.dimension_semantics<parallel>], iteration_bounds = array<i64: 1>, scalar_prefetch = 0 : i64, scratch_operands = 0 : i64, tpu.core_type = #tpu.core_type<tc>, window_params = [{transform_indices = @transform_0, window_bounds = array<i64: 8, 16>}, {transform_indices = @transform_1, window_bounds = array<i64: 8, 4>}, {pipeline_mode = #tpu.pipeline_mode<synchronous>, transform_indices = @transform_2, window_bounds = array<i64: 16, 128>}, {pipeline_mode = #tpu.pipeline_mode<synchronous>, transform_indices = @transform_3, window_bounds = array<i64: 4, 128>}, {pipeline_mode = #tpu.pipeline_mode<synchronous>, transform_indices = @transform_4, window_bounds = array<i64: 1, 128>}, {pipeline_mode = #tpu.pipeline_mode<synchronous>, transform_indices = @transform_5, window_bounds = array<i64: 128, 128>}, {pipeline_mode = #tpu.pipeline_mode<synchronous>, transform_indices = @transform_6, window_bounds = array<i64: 1, 128>}, {pipeline_mode = #tpu.pipeline_mode<synchronous>, transform_indices = @transform_7, window_bounds = array<i64: 128, 24>}, {pipeline_mode = #tpu.pipeline_mode<synchronous>, transform_indices = @transform_8, window_bounds = array<i64: 1, 24>}, {transform_indices = @transform_9, window_bounds = array<i64: 8, 24>}]} {
    %c0 = arith.constant 0 : index
    %c0_0 = arith.constant 0 : index
    %0 = vector.load %arg1[%c0, %c0_0] : memref<8x16xf32, #tpu.memory_space<vmem>>, vector<8x16xf32>
    %c0_1 = arith.constant 0 : index
    %c0_2 = arith.constant 0 : index
    %1 = vector.load %arg3[%c0_1, %c0_2] : memref<16x128xf32, #tpu.memory_space<vmem>>, vector<16x128xf32>
    %cst = arith.constant dense<0.000000e+00> : vector<8x128xf32>
    %2 = tpu.matmul %0, %1, %cst {dimension_numbers = #tpu.dot_dimension_numbers<[1], [0], [0], [1], [0, 0, 1, 1], [], []>} : vector<8x16xf32>, vector<16x128xf32>, vector<8x128xf32> -> vector<8x128xf32>
    %c0_3 = arith.constant 0 : index
    %c0_4 = arith.constant 0 : index
    %3 = vector.load %arg2[%c0_3, %c0_4] : memref<8x4xf32, #tpu.memory_space<vmem>>, vector<8x4xf32>
    %c0_5 = arith.constant 0 : index
    %c0_6 = arith.constant 0 : index
    %4 = vector.load %arg4[%c0_5, %c0_6] : memref<4x128xf32, #tpu.memory_space<vmem>>, vector<4x128xf32>
    %cst_7 = arith.constant dense<0.000000e+00> : vector<8x128xf32>
    %5 = tpu.matmul %3, %4, %cst_7 {dimension_numbers = #tpu.dot_dimension_numbers<[1], [0], [0], [1], [0, 0, 1, 1], [], []>} : vector<8x4xf32>, vector<4x128xf32>, vector<8x128xf32> -> vector<8x128xf32>
    %6 = arith.addf %2, %5 : vector<8x128xf32>
    %c0_8 = arith.constant 0 : index
    %c0_9 = arith.constant 0 : index
    %7 = vector.load %arg5[%c0_8, %c0_9] : memref<1x128xf32, #tpu.memory_space<vmem>>, vector<1x128xf32>
    %8 = vector.broadcast %7 : vector<1x128xf32> to vector<8x128xf32>
    %9 = arith.addf %6, %8 : vector<8x128xf32>
    %cst_10 = arith.constant 0.000000e+00 : f32
    %10 = vector.broadcast %cst_10 : f32 to vector<8x128xf32>
    %11 = arith.maximumf %9, %10 : vector<8x128xf32>
    %c0_11 = arith.constant 0 : index
    %c0_12 = arith.constant 0 : index
    %12 = vector.load %arg6[%c0_11, %c0_12] : memref<128x128xf32, #tpu.memory_space<vmem>>, vector<128x128xf32>
    %cst_13 = arith.constant dense<0.000000e+00> : vector<8x128xf32>
    %13 = tpu.matmul %11, %12, %cst_13 {dimension_numbers = #tpu.dot_dimension_numbers<[1], [0], [0], [1], [0, 0, 1, 1], [], []>} : vector<8x128xf32>, vector<128x128xf32>, vector<8x128xf32> -> vector<8x128xf32>
    %c0_14 = arith.constant 0 : index
    %c0_15 = arith.constant 0 : index
    %14 = vector.load %arg7[%c0_14, %c0_15] : memref<1x128xf32, #tpu.memory_space<vmem>>, vector<1x128xf32>
    %15 = vector.broadcast %14 : vector<1x128xf32> to vector<8x128xf32>
    %16 = arith.addf %13, %15 : vector<8x128xf32>
    %cst_16 = arith.constant 0.000000e+00 : f32
    %17 = vector.broadcast %cst_16 : f32 to vector<8x128xf32>
    %18 = arith.maximumf %16, %17 : vector<8x128xf32>
    %c0_17 = arith.constant 0 : index
    %c0_18 = arith.constant 0 : index
    %19 = vector.load %arg8[%c0_17, %c0_18] : memref<128x24xf32, #tpu.memory_space<vmem>>, vector<128x24xf32>
    %cst_19 = arith.constant dense<0.000000e+00> : vector<8x24xf32>
    %20 = tpu.matmul %18, %19, %cst_19 {dimension_numbers = #tpu.dot_dimension_numbers<[1], [0], [0], [1], [0, 0, 1, 1], [], []>} : vector<8x128xf32>, vector<128x24xf32>, vector<8x24xf32> -> vector<8x24xf32>
    %c0_20 = arith.constant 0 : index
    %c0_21 = arith.constant 0 : index
    %21 = vector.load %arg9[%c0_20, %c0_21] : memref<1x24xf32, #tpu.memory_space<vmem>>, vector<1x24xf32>
    %22 = vector.broadcast %21 : vector<1x24xf32> to vector<8x24xf32>
    %23 = arith.addf %20, %22 : vector<8x24xf32>
    %c0_22 = arith.constant 0 : index
    %c0_23 = arith.constant 0 : index
    %24 = vector.load %arg10[%c0_22, %c0_23] : memref<8x24xf32, #tpu.memory_space<vmem>>, vector<8x24xf32>
    tpu.vector_store %arg10[%c0_22, %c0_23], %23 {strides = array<i32>} : memref<8x24xf32, #tpu.memory_space<vmem>>, vector<8x24xf32>,
    return
  }
  func.func @transform_0(%arg0: i32) -> (i32, i32) {
    %c0_i32 = arith.constant 0 : i32
    %c0_i32_0 = arith.constant 0 : i32
    return %arg0, %c0_i32 : i32, i32
  }
  func.func @transform_1(%arg0: i32) -> (i32, i32) {
    %c0_i32 = arith.constant 0 : i32
    %c0_i32_0 = arith.constant 0 : i32
    return %arg0, %c0_i32 : i32, i32
  }
  func.func @transform_2(%arg0: i32) -> (i32, i32) {
    %c0_i32 = arith.constant 0 : i32
    %c0_i32_0 = arith.constant 0 : i32
    %c0_i32_1 = arith.constant 0 : i32
    return %c0_i32, %c0_i32_0 : i32, i32
  }
  func.func @transform_3(%arg0: i32) -> (i32, i32) {
    %c0_i32 = arith.constant 0 : i32
    %c0_i32_0 = arith.constant 0 : i32
    %c0_i32_1 = arith.constant 0 : i32
    return %c0_i32, %c0_i32_0 : i32, i32
  }
  func.func @transform_4(%arg0: i32) -> (i32, i32) {
    %c0_i32 = arith.constant 0 : i32
    %c0_i32_0 = arith.constant 0 : i32
    %c0_i32_1 = arith.constant 0 : i32
    return %c0_i32, %c0_i32_0 : i32, i32
  }
  func.func @transform_5(%arg0: i32) -> (i32, i32) {
    %c0_i32 = arith.constant 0 : i32
    %c0_i32_0 = arith.constant 0 : i32
    %c0_i32_1 = arith.constant 0 : i32
    return %c0_i32, %c0_i32_0 : i32, i32
  }
  func.func @transform_6(%arg0: i32) -> (i32, i32) {
    %c0_i32 = arith.constant 0 : i32
    %c0_i32_0 = arith.constant 0 : i32
    %c0_i32_1 = arith.constant 0 : i32
    return %c0_i32, %c0_i32_0 : i32, i32
  }
  func.func @transform_7(%arg0: i32) -> (i32, i32) {
    %c0_i32 = arith.constant 0 : i32
    %c0_i32_0 = arith.constant 0 : i32
    %c0_i32_1 = arith.constant 0 : i32
    return %c0_i32, %c0_i32_0 : i32, i32
  }
  func.func @transform_8(%arg0: i32) -> (i32, i32) {
    %c0_i32 = arith.constant 0 : i32
    %c0_i32_0 = arith.constant 0 : i32
    %c0_i32_1 = arith.constant 0 : i32
    return %c0_i32, %c0_i32_0 : i32, i32
  }
  func.func @transform_9(%arg0: i32) -> (i32, i32) {
    %c0_i32 = arith.constant 0 : i32
    %c0_i32_0 = arith.constant 0 : i32
    return %arg0, %c0_i32 : i32, i32
  }
}

</mosaic_0001>

<bundles_post_ra>
// kernel: tpu_custom_call.1
= control target key start
LH: loop header
LB: loop body
LE: loop exit
PB: predicated region body
PF: predicated region fallthrough
CT: control target
= control target key end

     0   :  { %v608_v3 = vmov 0.0|0.0   ;;  %v609_v4 = vmov 0.0   ;;  %vm42_vm0 = vcmask 1043456   ;;  %vm38_vm1 = vcmask 31744   ;;  %s815_s0 = inlined_call_operand.vmem [shape: f32[8,16], index: 0, kind: input, shape index: {}]   ;;  %s816_s1 = inlined_call_operand.vmem [shape: f32[8,4], index: 1, kind: input, shape index: {}]   ;;  %s817_s2 = inlined_call_operand.vmem [shape: f32[16,128], index: 2, kind: input, shape index: {}]   ;;  %s818_s3 = inlined_call_operand.vmem [shape: f32[4,128], index: 3, kind: input, shape index: {}]   ;;  %s819_s4 = inlined_call_operand.vmem [shape: f32[1,128], index: 4, kind: input, shape index: {}]   ;;  %s820_s5 = inlined_call_operand.vmem [shape: f32[128,128], index: 5, kind: input, shape index: {}]   ;;  %s821_s6 = inlined_call_operand.vmem [shape: f32[1,128], index: 6, kind: input, shape index: {}]   ;;  %s822_s7 = inlined_call_operand.vmem [shape: f32[128,24], index: 7, kind: input, shape index: {}]   ;;  %s823_s8 = inlined_call_operand.vmem [shape: f32[1,24], index: 8, kind: input, shape index: {}]   ;;  %s824_s9 = inlined_call_operand.hbm [shape: f32[8,24], index: 9, kind: output, shape index: {}]  }
   0x1   :  { %v34_v0 = vld [vmem:[%s817_s2] sm:$0xff]  ;;  %v35_v1 = vld [vmem:[%s817_s2 + $0x8] sm:$0xff]  ;;  %529 = vmatprep.subr.bf16.mxu1 %v608_v3  ;;  %447 = vmatprep.subr.mxu0 %v609_v4  ;;  %vm610_vm2 = vmmov 0   ;;  %v201_v9 = vld [vmem:[%s820_s5 + $0x10] sm:$0xff]  ;;  %vm116_vm3 = vcmask 130048  }
   0x2   :  { %v37_v2 = vld [vmem:[%s818_s3] sm:$0xf]  ;;  %v530_v5 = vpack.c.bf16 %v35_v1, %v34_v0  ;;  %449 = vmatprep.mubr.msk.f32.mxu0 %vm610_vm2, %v609_v4  ;;  %v200_v8 = vld [vmem:[%s820_s5 + $0x8] sm:$0xff]  ;;  %v202_v10 = vld [vmem:[%s820_s5 + $0x18] sm:$0xff]  ;;  %456 = vmatprep.mubr.msk.f32.mxu1 %vm610_vm2, %v609_v4 }
   0x3   :  { %v36_v6 = vld [vmem:[%s816_s1] sm:$0xff]  ;;  %448 = vmatpush3.msk.msra.mxu0 %vm42_vm0, %v37_v2  ;;  %v536_v13 = vpack.c.bf16 %v202_v10, %v201_v9 }
   0x4   :  { %v199_v7 = vld [vmem:[%s820_s5] sm:$0xff]  ;;  %531 = vmatpush3.bf16.msra.mxu1 %v530_v5  ;;  %450 = vmatmul.mubr.msk.f32.vlgmr.msra.gmra.mrb[0].mxu0 %vm38_vm1, %v36_v6 }
   0x5   :  { %v33_v11 = vld [vmem:[%s815_s0] sm:$0xff]  ;;  %v533_v12 = vpack.c.bf16 %v200_v8, %v199_v7  ;;  %532 = vmatprep.subr.bf16.mxu0 %v608_v3  ;;  %491 = vmatprep.mubr.msk.f32.mxu0 %vm610_vm2, %v609_v4 }
   0x7   :  { %534 = vmatpush3.bf16.msra.mxu0 %v533_v12 }
   0x8   :  { %14 = vsyncpa [#allocation3], 0  ;;  %457 = vmatmul.mubr.msk.f32.vlgmr.msra.gmra.mrb[0].mxu1 %vm116_vm3, %v33_v11  ;;  %535 = vmatprep.subr.bf16.mxu0 %v608_v3  ;;  %v203_v14 = vld [vmem:[%s820_s5 + $0x20] sm:$0xff]  ;;  %v204_v15 = vld [vmem:[%s820_s5 + $0x28] sm:$0xff]  ;;  %s611_s11 = smov [#allocation2]   ;;  %vm386_vm4 = vcmask 195584  }
   0x9   :  { %556 = vmatprep.subr.bf16.mxu1 %v608_v3  ;;  %526 = vmatprep.mubr.msk.f32.mxu1 %vm610_vm2, %v609_v4  ;;  %v539_v16 = vpack.c.bf16 %v204_v15, %v203_v14  ;;  %v205_v17 = vld [vmem:[%s820_s5 + $0x30] sm:$0xff]  ;;  %v206_v18 = vld [vmem:[%s820_s5 + $0x38] sm:$0xff]  ;;  %v207_v20 = vld [vmem:[%s820_s5 + $0x40] sm:$0xff]  ;;  %s394_s12 = sshll.u32 %s611_s11, 4  ;;  %s395_s12 = int_to_ptr.vmem [resolvable:$true] %s394_s12 }
   0xa   :  { %v542_v19 = vpack.c.bf16 %v206_v18, %v205_v17  ;;  %v208_v21 = vld [vmem:[%s820_s5 + $0x48] sm:$0xff]  ;;  %v209_v23 = vld [vmem:[%s820_s5 + $0x50] sm:$0xff]  ;;  %v210_v24 = vld [vmem:[%s820_s5 + $0x58] sm:$0xff]  ;;  %p589_p1 = scmp.lt.s32.totalorder %s395_s12, %s395_s12 }
   0xb   :  { %537 = vmatpush3.bf16.msra.mxu0 %v536_v13  ;;  %v545_v22 = vpack.c.bf16 %v208_v21, %v207_v20  ;;  %v548_v25 = vpack.c.bf16 %v210_v24, %v209_v23  ;;  %v211_v26 = vld [vmem:[%s820_s5 + $0x60] sm:$0xff]  ;;  %v212_v27 = vld [vmem:[%s820_s5 + $0x68] sm:$0xff]  ;;  %v213_v29 = vld [vmem:[%s820_s5 + $0x70] sm:$0xff] }
   0xc   :  { %538 = vmatprep.subr.bf16.mxu0 %v608_v3  ;;  %v551_v28 = vpack.c.bf16 %v212_v27, %v211_v26  ;;  %v214_v30 = vld [vmem:[%s820_s5 + $0x78] sm:$0xff]  ;;  %v293_v32 = vld [vmem:[%s822_s7] sm:$0xff]  ;;  %v294_v33 = vld [vmem:[%s822_s7 + $0x8] sm:$0xff] }
   0xd   :  { %v554_v31 = vpack.c.bf16 %v214_v30, %v213_v29  ;;  %v295_v34 = vld [vmem:[%s822_s7 + $0x10] sm:$0xff]  ;;  %v557_v35 = vpack.c.bf16 %v294_v33, %v293_v32  ;;  %v296_v36 = vld [vmem:[%s822_s7 + $0x18] sm:$0xff]  ;;  %v297_v38 = vld [vmem:[%s822_s7 + $0x20] sm:$0xff] }
   0xe   :  { %v560_v37 = vpack.c.bf16 %v296_v36, %v295_v34  ;;  %v298_v39 = vld [vmem:[%s822_s7 + $0x28] sm:$0xff]  ;;  %v299_v41 = vld [vmem:[%s822_s7 + $0x30] sm:$0xff]  ;;  %v300_v42 = vld [vmem:[%s822_s7 + $0x38] sm:$0xff] }
   0xf   :  { %540 = vmatpush3.bf16.msra.mxu0 %v539_v16  ;;  %558 = vmatpush3.bf16.msra.mxu1 %v557_v35  ;;  %v563_v40 = vpack.c.bf16 %v298_v39, %v297_v38  ;;  %v566_v43 = vpack.c.bf16 %v300_v42, %v299_v41  ;;  %v301_v44 = vld [vmem:[%s822_s7 + $0x40] sm:$0xff]  ;;  %v302_v45 = vld [vmem:[%s822_s7 + $0x48] sm:$0xff]  ;;  %v303_v47 = vld [vmem:[%s822_s7 + $0x50] sm:$0xff] }
  0x10   :  { %541 = vmatprep.subr.bf16.mxu0 %v608_v3  ;;  %559 = vmatprep.subr.bf16.mxu1 %v608_v3  ;;  %v569_v46 = vpack.c.bf16 %v302_v45, %v301_v44  ;;  %v304_v48 = vld [vmem:[%s822_s7 + $0x58] sm:$0xff]  ;;  %v305_v50 = vld [vmem:[%s822_s7 + $0x60] sm:$0xff]  ;;  %v306_v51 = vld [vmem:[%s822_s7 + $0x68] sm:$0xff] }
  0x11   :  { %v572_v49 = vpack.c.bf16 %v304_v48, %v303_v47  ;;  %v575_v52 = vpack.c.bf16 %v306_v51, %v305_v50  ;;  %v405_v56 = vld [vmem:[%s819_s4] ss:$0 sm:$0xff]  ;;  %v307_v61 = vld [vmem:[%s822_s7 + $0x70] sm:$0xff]  ;;  %v308_v62 = vld [vmem:[%s822_s7 + $0x78] sm:$0xff]  ;;  %s584_s7 = scalar_lea.vmem %s395_s12, 128 }
  0x12   :  { %v578_v63 = vpack.c.bf16 %v308_v62, %v307_v61  ;;  %v406_v0 = vld [vmem:[%s821_s6] ss:$0 sm:$0xff]  ;;  %p585_p0 = scmp.ne.s32.totalorder %s395_s12, %s584_s7  ;;  %p590_p2 = scmp.lt.s32.totalorder %s584_s7, %s584_s7 }
  0x13   :  { %543 = vmatpush3.bf16.msra.mxu0 %v542_v19  ;;  %561 = vmatpush3.bf16.msra.mxu1 %v560_v37  ;;  %v407_v5 = vld [vmem:[%s823_s8] ss:$0 sm:$0xff] }
  0x14   :  { %544 = vmatprep.subr.bf16.mxu0 %v608_v3  ;;  %562 = vmatprep.subr.bf16.mxu1 %v608_v3  ;;  %p591_p3 = por %p590_p2, %p589_p1 }
  0x16   :  { %p592_p4 = pnand %p591_p3, %p585_p0 }
  0x17   :  { %546 = vmatpush3.bf16.msra.mxu0 %v545_v22  ;;  %564 = vmatpush3.bf16.msra.mxu1 %v563_v40 }
  0x18   :  { %547 = vmatprep.subr.bf16.mxu0 %v608_v3  ;;  %565 = vmatprep.subr.bf16.mxu1 %v608_v3 }
  0x1b   :  { %549 = vmatpush3.bf16.msra.mxu0 %v548_v25  ;;  %567 = vmatpush3.bf16.msra.mxu1 %v566_v43 }
  0x1c   :  { %550 = vmatprep.subr.bf16.mxu0 %v608_v3  ;;  %568 = vmatprep.subr.bf16.mxu1 %v608_v3 }
  0x1f   :  { %552 = vmatpush3.bf16.msra.mxu0 %v551_v28  ;;  %570 = vmatpush3.bf16.msra.mxu1 %v569_v46 }
  0x20   :  { %553 = vmatprep.subr.bf16.mxu0 %v608_v3  ;;  %571 = vmatprep.subr.bf16.mxu1 %v608_v3 }
  0x23   :  { %555 = vmatpush3.bf16.msra.mxu0 %v554_v31  ;;  %573 = vmatpush3.bf16.msra.mxu1 %v572_v49 }
  0x24   :  { %574 = vmatprep.subr.bf16.mxu1 %v608_v3 }
  0x27   :  { %576 = vmatpush3.bf16.msra.mxu1 %v575_v52 }
  0x28   :  { %577 = vmatprep.subr.bf16.mxu1 %v608_v3 }
  0x2b   :  { %579 = vmatpush3.bf16.msra.mxu1 %v578_v63 }
  0xd7   :  { %v112_v53 = vpop.f32.mrb[0].mxu0 }
  0xd8   :  { %v451_v54 = vpop.f32.mrb[1].mxu0 }
  0xdb   :  { %v186_v55 = vpop.f32.mrb[0].mxu1 }
  0xdc   :  { %v187_v57 = vadd.f32 %v186_v55, %v112_v53  ;;  %v458_v58 = vpop.f32.mrb[1].mxu1 }
  0xde   :  { %v197_v59 = vadd.f32 %v405_v56, %v187_v57 }
  0xe0   :  { %v198_v60 = vmax.f32 %v197_v59, 0.0 }
  0xe2   :  { %492 = vmatmul.mubr.f32.vlgmr.msra.gmra.mrb[2].mxu0 %v198_v60 }
 0x1b5   :  { %v288_v1 = vpop.f32.mrb[2].mxu0 }
 0x1b6   :  { %v289_v2 = vadd.f32 %v406_v0, %v288_v1  ;;  %v493_v3 = vpop.f32.mrb[3].mxu0 }
 0x1b8   :  { %v292_v4 = vmax.f32 %v289_v2, 0.0 }
 0x1ba   :  { %527 = vmatmul.mubr.f32.vlgmr.msra.gmra.mrb[2].mxu1 %v292_v4 }
 0x28d   :  { %v382_v6 = vpop.f32.mrb[2].mxu1 }
 0x28e   :  { %v383_v7 = vadd.f32 %v407_v5, %v382_v6  ;;  %v528_v8 = vpop.f32.mrb[3].mxu1 }
 0x290   :  { %387 = vst.msk [vmem:[#allocation2] sm:$0xff] %vm386_vm4, %v383_v7 }
 0x291   :  { %595 = shalt.err (!%p592_p4)
}
 0x292   :  { %s596_s14 = scalar_lea.hbm %s824_s9, 128 }
 0x293   :  { %p597_p5 = scmp.ne.s32.totalorder %s824_s9, %s596_s14  ;;  %p600_p6 = scmp.lt.u32.totalorder %s596_s14, %s824_s9 }
 0x295   :  { %p602_p7 = pnand %p600_p6, %p597_p5 }
 0x297   :  { %605 = shalt.err (!%p602_p7)
}
 0x298   :  { %397 = dma.vmem_to_hbm [thread:$0]  %s395_s12, 128, %s824_s9, [#allocation3]  }
 0x299   :  { %606 = dma.done.wait [#allocation3], 128  }
 0x29a   :  { %607 = vsyncadd [#allocation3], 4294967168 }
 0x29b   :  { %401 = vsyncpa [#allocation3], 1 }

</bundles_post_ra>
